<compile_context>
chip_gen: v5e
topology: v5e:2x2
jax: 0.10.0
libtpu: 0.0.40
codegen_flags: <defaults>
</compile_context>

<pallas_src>
import numpy as np
import jax
import jax.numpy as jnp
from jax.experimental import pallas as pl
from jax.experimental.pallas import tpu as pltpu


def _round_up(n, m):
    return ((int(n) + m - 1) // m) * m


def _device_tuning():
    """Per-generation defaults: (tile_m cap, tile_k cap, scoped-VMEM bytes)."""
    kind = ""
    try:
        kind = jax.devices()[0].device_kind.lower()
    except Exception:
        pass
    if ("v5" in kind) or ("v6" in kind):
        # 128 MiB physical VMEM: big tiles amortize per-grid-step overhead.
        return 512, 1024, 96 * 1024 * 1024
    # v7x (64 MiB VMEM), interpreter, unknown: conservative sizing.
    return 256, 512, 48 * 1024 * 1024


def _pick_tile_m(nd, cap):
    # Power-of-two row tile >= 16 (bf16 sublane packing), capped, and kept
    # small enough that the "parallel" dst axis has >= 2 steps when possible
    # (megacore / v7x dual-TC sharding).
    tm = 16
    while tm * 2 <= cap and tm * 4 <= _round_up(nd, 16):
        tm *= 2
    return tm


def _pick_tile_k(ns, cap):
    tk = 128
    while tk * 2 <= cap and tk * 2 <= _round_up(ns, 128):
        tk *= 2
    return tk


def _dropout_keep(shape, row0, seed_mix):
    # F.dropout(p=0.5) keep-mask from an integer hash of (global element
    # index, layer seed).  Portable (no TPU-only PRNG) so it also runs under
    # the Pallas interpreter; mask is deterministic per call (benchmark
    # semantics, not fresh training randomness).  rows*cols may wrap in int32
    # for huge outputs -- harmless for a hash.
    rows = jax.lax.broadcasted_iota(jnp.int32, shape, 0) + row0
    cols = jax.lax.broadcasted_iota(jnp.int32, shape, 1)
    v = (rows * shape[-1] + cols).astype(jnp.uint32) + seed_mix
    v = v ^ (v >> 16)
    v = v * jnp.uint32(0x7FEB352D)
    v = v ^ (v >> 15)
    v = v * jnp.uint32(0x846CA68B)
    v = v ^ (v >> 16)
    return v < jnp.uint32(1 << 31)


# --------------------------- XW = x @ W_agg (hoisted) ------------------------

def _make_xw_kernel(k_steps):
    def kernel(x_ref, w_ref, o_ref, acc_ref):
        k = pl.program_id(1)          # top-level only (interpreter-safe)
        part = jnp.dot(x_ref[...], w_ref[...], preferred_element_type=jnp.float32)

        @pl.when(k == 0)
        def _():
            acc_ref[...] = part       # direct write, no zero-init RMW

        @pl.when(k > 0)
        def _():
            acc_ref[...] += part

        @pl.when(k == k_steps - 1)
        def _():
            o_ref[...] = acc_ref[...].astype(o_ref.dtype)

    return kernel


def _project_x(x_src, w_p, vmem_bytes):
    """XW = x_src @ w_p (bf16 out), computed once instead of per dst tile."""
    M, K = x_src.shape
    _, N = w_p.shape
    rt = 16
    while rt * 2 <= 256 and M % (rt * 2) == 0:
        rt *= 2
    kt = 128
    while kt * 2 <= 512 and K % (kt * 2) == 0:
        kt *= 2
    return pl.pallas_call(
        _make_xw_kernel(K // kt),
        out_shape=jax.ShapeDtypeStruct((M, N), jnp.bfloat16),
        grid=(M // rt, K // kt),
        in_specs=[
            pl.BlockSpec((rt, kt), lambda i, k: (i, k)),
            pl.BlockSpec((kt, N), lambda i, k: (k, 0)),
        ],
        out_specs=pl.BlockSpec((rt, N), lambda i, k: (i, 0)),
        scratch_shapes=[pltpu.VMEM((rt, N), jnp.float32)],
        compiler_params=pltpu.CompilerParams(
            dimension_semantics=("parallel", "arbitrary"),
            vmem_limit_bytes=vmem_bytes),
    )(x_src, w_p)


# ------------------------------ layer kernel --------------------------------

def _make_layer_kernel(project_early, k_steps, tm, seed):
    seed_mix = np.uint32((int(seed) * 0x9E3779B9) & 0xFFFFFFFF)

    if project_early:
        # K-stream operand is the precomputed XW; accumulator in fo space.
        def kernel(a_ref, xw_ref, xr_ref, wr_ref, b_ref, dinv_ref, o_ref, acc_ref):
            i = pl.program_id(0)      # hoisted out of pl.when bodies
            k = pl.program_id(1)
            part = jnp.dot(a_ref[...], xw_ref[...],
                           preferred_element_type=jnp.float32)

            @pl.when(k == 0)
            def _():
                acc_ref[...] = part

            @pl.when(k > 0)
            def _():
                acc_ref[...] += part

            @pl.when(k == k_steps - 1)
            def _():
                h = acc_ref[...] * dinv_ref[...]          # mean = sum * 1/deg (f32 exact)
                h = h + jnp.dot(xr_ref[...], wr_ref[...],
                                preferred_element_type=jnp.float32)
                h = h + b_ref[...]
                h = jnp.maximum(h, 0.0)
                keep = _dropout_keep(h.shape, i * tm, seed_mix)
                o_ref[...] = jnp.where(keep, h + h, 0.0).astype(o_ref.dtype)
    else:
        # K-stream operand is x; accumulator in fi space, W_agg applied once
        # per dst tile in the epilogue.
        def kernel(a_ref, xk_ref, xr_ref, wa_ref, wr_ref, b_ref, dinv_ref, o_ref, acc_ref):
            i = pl.program_id(0)
            k = pl.program_id(1)
            part = jnp.dot(a_ref[...], xk_ref[...],
                           preferred_element_type=jnp.float32)

            @pl.when(k == 0)
            def _():
                acc_ref[...] = part

            @pl.when(k > 0)
            def _():
                acc_ref[...] += part

            @pl.when(k == k_steps - 1)
            def _():
                agg = (acc_ref[...] * dinv_ref[...]).astype(jnp.bfloat16)
                h = jnp.dot(agg, wa_ref[...], preferred_element_type=jnp.float32)
                h = h + jnp.dot(xr_ref[...], wr_ref[...],
                                preferred_element_type=jnp.float32)
                h = h + b_ref[...]
                h = jnp.maximum(h, 0.0)
                keep = _dropout_keep(h.shape, i * tm, seed_mix)
                o_ref[...] = jnp.where(keep, h + h, 0.0).astype(o_ref.dtype)

    return kernel


def sage_layer(x_p, n_src, row, colptr, wa_p, wr_p, b_p, seed, tuning):
    """One CuGraphSAGEConv (mean aggr) + ReLU + dropout(0.5).

    x_p is the bf16, column-padded activation (rows >= n_src).  Returns the
    bf16 padded output (nd_p, fo_p) and the true dst-row count nd."""
    tile_m_cap, tile_k_cap, vmem_bytes = tuning
    fi_p, fo_p = int(wa_p.shape[0]), int(wa_p.shape[1])
    colptr = np.asarray(colptr, dtype=np.int64)
    nd = len(colptr) - 1
    ns = int(n_src)

    tm = _pick_tile_m(nd, tile_m_cap)
    tk = _pick_tile_k(ns, tile_k_cap)
    nd_p = _round_up(nd, tm)
    ns_p = _round_up(ns, tk)
    nx_p = max(ns_p, nd_p)
    k_steps = ns_p // tk

    # Graph structure: 0/1(-count) bf16 adjacency built on device (scatter-add),
    # exact f32 1/deg applied in the kernel epilogue.
    E = int(colptr[-1])
    deg = np.diff(colptr).astype(np.int64)
    a01 = jnp.zeros((nd_p, ns_p), jnp.bfloat16)
    if E:
        dst = np.repeat(np.arange(nd, dtype=np.int32), deg)
        src = np.asarray(row[:E], dtype=np.int32)
        a01 = a01.at[jnp.asarray(dst), jnp.asarray(src)].add(1.0)
    inv = np.zeros((nd_p, 1), np.float32)
    inv[:nd, 0] = np.where(deg > 0, 1.0 / np.maximum(deg, 1), 0.0)
    inv_deg = jnp.asarray(inv)

    # Activations stay bf16 + padded between layers; only extend rows here.
    assert int(x_p.shape[1]) == fi_p
    if int(x_p.shape[0]) < nx_p:
        x_p = jnp.pad(x_p, ((0, nx_p - int(x_p.shape[0])), (0, 0)))

    project_early = fo_p < fi_p
    kernel = _make_layer_kernel(project_early, k_steps, tm, seed)

    # TODO(synk): for very wide layers on v7x, single-buffer the resident
    # (fi_p, fo_p) weight blocks (pipeline_mode=pl.Buffered(1)) or tile fo.
    if project_early:
        x_src = x_p if int(x_p.shape[0]) == ns_p else x_p[:ns_p]
        xw_p = _project_x(x_src, wa_p, vmem_bytes)      # hoisted x @ W_agg
        operands = (a01, xw_p, x_p, wr_p, b_p, inv_deg)
        in_specs = [
            pl.BlockSpec((tm, tk), lambda i, k: (i, k)),      # adjacency counts
            pl.BlockSpec((tk, fo_p), lambda i, k: (k, 0)),    # XW neighbor rows
            pl.BlockSpec((tm, fi_p), lambda i, k: (i, 0)),    # root/self rows
            pl.BlockSpec((fi_p, fo_p), lambda i, k: (0, 0)),  # W_root (resident)
            pl.BlockSpec((1, fo_p), lambda i, k: (0, 0)),     # bias
            pl.BlockSpec((tm, 1), lambda i, k: (i, 0)),       # 1/deg
        ]
        acc_cols = fo_p
    else:
        operands = (a01, x_p, x_p, wa_p, wr_p, b_p, inv_deg)
        in_specs = [
            pl.BlockSpec((tm, tk), lambda i, k: (i, k)),      # adjacency counts
            pl.BlockSpec((tk, fi_p), lambda i, k: (k, 0)),    # x neighbor rows
            pl.BlockSpec((tm, fi_p), lambda i, k: (i, 0)),    # root/self rows
            pl.BlockSpec((fi_p, fo_p), lambda i, k: (0, 0)),  # W_agg (resident)
            pl.BlockSpec((fi_p, fo_p), lambda i, k: (0, 0)),  # W_root (resident)
            pl.BlockSpec((1, fo_p), lambda i, k: (0, 0)),     # bias
            pl.BlockSpec((tm, 1), lambda i, k: (i, 0)),       # 1/deg
        ]
        acc_cols = fi_p

    out = pl.pallas_call(
        kernel,
        out_shape=jax.ShapeDtypeStruct((nd_p, fo_p), jnp.bfloat16),
        grid=(nd_p // tm, k_steps),
        in_specs=in_specs,
        out_specs=pl.BlockSpec((tm, fo_p), lambda i, k: (i, 0)),
        scratch_shapes=[pltpu.VMEM((tm, acc_cols), jnp.float32)],
        compiler_params=pltpu.CompilerParams(
            dimension_semantics=("parallel", "arbitrary"),
            vmem_limit_bytes=vmem_bytes),
    )(*operands)

    return out, nd


# ------------------------------- host glue ----------------------------------

def to_csc(edge_index, size):
    """Replicates CuGraphSAGEConv.to_csc: sort edges by dst, build colptr.

    Returns [row, colptr, num_src_nodes] (same layout as the PyTorch module)."""
    row, col = edge_index
    num_src, num_dst = size
    perm = np.argsort(col, kind="stable")
    row = row[perm].astype(np.int64)
    col = col[perm]
    counts = np.zeros(num_dst + 1, dtype=np.int64)
    np.add.at(counts, col + 1, 1)
    colptr = np.cumsum(counts)
    return [row, colptr, int(num_src)]


class CuGraphSAGEPallas:
    def __init__(self, in_channels, hidden_channels, out_channels, num_layers, key):
        dims = [(in_channels, hidden_channels)]
        dims += [(hidden_channels, hidden_channels)] * (num_layers - 2)
        dims += [(hidden_channels, out_channels)]
        self.dims = dims
        self.out_channels = out_channels
        self.tuning = _device_tuning()
        self.params = []
        for (fi, fo) in dims:
            key, k1, k2, k3 = jax.random.split(key, 4)
            # torch.nn.Linear(2*fi, fo) default init: U(-1/sqrt(fan_in), +)
            bound = 1.0 / float(np.sqrt(2 * fi))
            wa = jax.random.uniform(k1, (fi, fo), jnp.float32, -bound, bound)
            wr = jax.random.uniform(k2, (fi, fo), jnp.float32, -bound, bound)
            b = jax.random.uniform(k3, (1, fo), jnp.float32, -bound, bound)
            fi_p, fo_p = _round_up(fi, 128), _round_up(fo, 128)
            # Pad + cast ONCE here (not per forward): bf16 weights, f32 bias.
            wa_p = jnp.zeros((fi_p, fo_p), jnp.bfloat16).at[:fi, :fo].set(
                wa.astype(jnp.bfloat16))
            wr_p = jnp.zeros((fi_p, fo_p), jnp.bfloat16).at[:fi, :fo].set(
                wr.astype(jnp.bfloat16))
            b_p = jnp.zeros((1, fo_p), jnp.float32).at[:, :fo].set(b)
            self.params.append((wa_p, wr_p, b_p))

    def forward(self, x, edge_index, num_sampled_nodes):
        # edge = [row, colptr, num_src] -- same structure as the PyTorch module.
        # Host side only does tiny index math; dense A is built on device.
        # TODO(synk): cache the per-layer graph structures across calls.
        edge = to_csc(edge_index, (x.shape[0], int(np.sum(num_sampled_nodes))))
        n_rows = int(x.shape[0])

        fi0 = self.dims[0][0]
        fi0_p = int(self.params[0][0].shape[0])
        x_p = jnp.pad(jnp.asarray(x, jnp.bfloat16), ((0, 0), (0, fi0_p - fi0)))

        for i, (wa_p, wr_p, b_p) in enumerate(self.params):
            if i > 0:
                # exact trim-to-layer arithmetic from the reference forward()
                new_num_edges = int(edge[1][-2])
                edge[0] = edge[0][:new_num_edges]
                edge[1] = edge[1][: len(edge[1]) - int(num_sampled_nodes[-i - 1])]
                edge[2] = n_rows
            x_p, n_rows = sage_layer(x_p, edge[2], edge[0], edge[1],
                                     wa_p, wr_p, b_p, seed=1234 + i,
                                     tuning=self.tuning)

        # Slice to seed nodes / true channels only once, after the last layer.
        out = x_p[: int(num_sampled_nodes[0]), : self.out_channels]
        return out.astype(jnp.float32)


# ---------------------------------- main -------------------------------------

if __name__ == "__main__":
    key = jax.random.PRNGKey(0)

    # Channel sizes chosen so both kernel paths run: layer 0 exercises the
    # hoisted x@W_agg (project-early) path, layers 1-2 the late-projection path.
    IN_CH, HID_CH, OUT_CH, NUM_LAYERS = 192, 64, 16, 3

    # Synthetic neighbor-sampled MFG: 4 seed nodes, 8 hop-1 nodes, 16 hop-2 nodes.
    num_sampled_nodes = np.array([4, 8, 16], dtype=np.int64)
    n_total = int(num_sampled_nodes.sum())  # 28

    edges = []  # (src, dst)
    for s in range(4):                      # edges into seed nodes from hop-1 nodes
        edges.append((4 + 2 * s, s))
        edges.append((5 + 2 * s, s))
    for h in range(8):                      # edges into hop-1 nodes from nodes 12..19
        edges.append((12 + (h % 8), 4 + h))
        edges.append((12 + ((h + 3) % 8), 4 + h))
    edge_index = np.array(edges, dtype=np.int64).T  # [2, E], E = 24

    key, kx, kp = jax.random.split(key, 3)
    x = jax.random.normal(kx, (n_total, IN_CH), dtype=jnp.float32)

    model = CuGraphSAGEPallas(IN_CH, HID_CH, OUT_CH, NUM_LAYERS, kp)
    out = model.forward(x, edge_index, num_sampled_nodes)
    out = jax.block_until_ready(out)

    assert out.shape == (int(num_sampled_nodes[0]), OUT_CH), out.shape
    assert bool(jnp.all(jnp.isfinite(out)))
    print("KERNEL_OK")
</pallas_src>

<mosaic_0001>
module attributes {stable_mosaic.version = 11 : i64} {
  func.func @kernel(%arg0: i32, %arg1: i32, %arg2: memref<128x256xbf16, #tpu.memory_space<vmem>>, %arg3: memref<256x128xbf16, #tpu.memory_space<vmem>>, %arg4: memref<128x128xbf16, #tpu.memory_space<vmem>>, %arg5: memref<128x128xf32, #tpu.memory_space<vmem>>) attributes {dimension_semantics = [#tpu.dimension_semantics<parallel>, #tpu.dimension_semantics<arbitrary>], iteration_bounds = array<i64: 1, 1>, scalar_prefetch = 0 : i64, scratch_operands = 1 : i64, tpu.core_type = #tpu.core_type<tc>, window_params = [{transform_indices = @transform_0, window_bounds = array<i64: 128, 256>}, {transform_indices = @transform_1, window_bounds = array<i64: 256, 128>}, {transform_indices = @transform_2, window_bounds = array<i64: 128, 128>}]} {
    %c0 = arith.constant 0 : index
    %c0_0 = arith.constant 0 : index
    %0 = vector.load %arg2[%c0, %c0_0] : memref<128x256xbf16, #tpu.memory_space<vmem>>, vector<128x256xbf16>
    %c0_1 = arith.constant 0 : index
    %c0_2 = arith.constant 0 : index
    %1 = vector.load %arg3[%c0_1, %c0_2] : memref<256x128xbf16, #tpu.memory_space<vmem>>, vector<256x128xbf16>
    %cst = arith.constant dense<0.000000e+00> : vector<128x128xf32>
    %2 = tpu.matmul %0, %1, %cst {dimension_numbers = #tpu.dot_dimension_numbers<[1], [0], [0], [1], [0, 0, 1, 1], [], []>} : vector<128x256xbf16>, vector<256x128xbf16>, vector<128x128xf32> -> vector<128x128xf32>
    %c0_i32 = arith.constant 0 : i32
    %3 = arith.cmpi eq, %arg1, %c0_i32 : i32
    %4 = arith.extui %3 : i1 to i32
    %c0_i32_3 = arith.constant 0 : i32
    %5 = arith.cmpi ne, %4, %c0_i32_3 : i32
    scf.if %5 {
      %c0_8 = arith.constant 0 : index
      %c0_9 = arith.constant 0 : index
      %12 = vector.load %arg5[%c0_8, %c0_9] : memref<128x128xf32, #tpu.memory_space<vmem>>, vector<128x128xf32>
      tpu.vector_store %arg5[%c0_8, %c0_9], %2 {strides = array<i32>} : memref<128x128xf32, #tpu.memory_space<vmem>>, vector<128x128xf32>,
    } else {
    }
    %c0_i32_4 = arith.constant 0 : i32
    %6 = arith.cmpi sgt, %arg1, %c0_i32_4 : i32
    %7 = arith.extui %6 : i1 to i32
    %c0_i32_5 = arith.constant 0 : i32
    %8 = arith.cmpi ne, %7, %c0_i32_5 : i32
    scf.if %8 {
      %c0_8 = arith.constant 0 : index
      %c0_9 = arith.constant 0 : index
      %12 = vector.load %arg5[%c0_8, %c0_9] : memref<128x128xf32, #tpu.memory_space<vmem>>, vector<128x128xf32>
      %13 = arith.addf %12, %2 : vector<128x128xf32>
      %c0_10 = arith.constant 0 : index
      %c0_11 = arith.constant 0 : index
      %14 = vector.load %arg5[%c0_10, %c0_11] : memref<128x128xf32, #tpu.memory_space<vmem>>, vector<128x128xf32>
      tpu.vector_store %arg5[%c0_10, %c0_11], %13 {strides = array<i32>} : memref<128x128xf32, #tpu.memory_space<vmem>>, vector<128x128xf32>,
    } else {
    }
    %c0_i32_6 = arith.constant 0 : i32
    %9 = arith.cmpi eq, %arg1, %c0_i32_6 : i32
    %10 = arith.extui %9 : i1 to i32
    %c0_i32_7 = arith.constant 0 : i32
    %11 = arith.cmpi ne, %10, %c0_i32_7 : i32
    scf.if %11 {
      %c0_8 = arith.constant 0 : index
      %c0_9 = arith.constant 0 : index
      %12 = vector.load %arg5[%c0_8, %c0_9] : memref<128x128xf32, #tpu.memory_space<vmem>>, vector<128x128xf32>
      %13 = arith.truncf %12 : vector<128x128xf32> to vector<128x128xbf16>
      %c0_10 = arith.constant 0 : index
      %c0_11 = arith.constant 0 : index
      %14 = vector.load %arg4[%c0_10, %c0_11] : memref<128x128xbf16, #tpu.memory_space<vmem>>, vector<128x128xbf16>
      tpu.vector_store %arg4[%c0_10, %c0_11], %13 {strides = array<i32>} : memref<128x128xbf16, #tpu.memory_space<vmem>>, vector<128x128xbf16>,
    } else {
    }
    return
  }
  func.func @transform_0(%arg0: i32, %arg1: i32) -> (i32, i32) {
    %c0_i32 = arith.constant 0 : i32
    return %arg0, %arg1 : i32, i32
  }
  func.func @transform_1(%arg0: i32, %arg1: i32) -> (i32, i32) {
    %c0_i32 = arith.constant 0 : i32
    %c0_i32_0 = arith.constant 0 : i32
    return %arg1, %c0_i32 : i32, i32
  }
  func.func @transform_2(%arg0: i32, %arg1: i32) -> (i32, i32) {
    %c0_i32 = arith.constant 0 : i32
    %c0_i32_0 = arith.constant 0 : i32
    return %arg0, %c0_i32 : i32, i32
  }
}

</mosaic_0001>

<bundles_post_ra>
// kernel: tpu_custom_call.1
= control target key start
LH: loop header
LB: loop body
LE: loop exit
PB: predicated region body
PF: predicated region fallthrough
CT: control target
= control target key end

     0   :  { %7 = vsyncpa [#allocation4], 0  ;;  %s854_s0 = inlined_call_operand.hbm [shape: bf16[128,256], index: 0, kind: input, shape index: {}]   ;;  %s855_s1 = inlined_call_operand.hbm [shape: bf16[256,128], index: 1, kind: input, shape index: {}]   ;;  %s856_s2 = inlined_call_operand.hbm [shape: bf16[128,128], index: 2, kind: output, shape index: {}]  }
   0x1   :  { %8 = vsyncpa [#allocation7], 0 }
   0x2   :  { %9 = vsyncpa [#allocation5], 0  ;;  %s14_s11 = sshll.u32 %s854_s0, 4  ;;  %s817_s12 = smov [#allocation3]   ;;  %s15_s11 = int_to_ptr.hbm [resolvable:$true] %s14_s11 }
   0x3   :  { %s16_s13 = sshll.u32 %s817_s12, 4  ;;  %s27_s16 = sshll.u32 %s855_s1, 4  ;;  %s17_s13 = int_to_ptr.vmem [resolvable:$true] %s16_s13  ;;  %s28_s16 = int_to_ptr.hbm [resolvable:$true] %s27_s16 }
   0x4   :  { %s818_s17 = smov 128   ;;  %s819_s18 = smov 8  }
   0x5   :  { %22 = dma.hbm_to_vmem [thread:$0]  %s15_s11, 2048, %s17_s13, [#allocation4], %s818_s17, %s818_s17, %s819_s18  }
   0x6   :  { %s820_s19 = smov [#allocation6]   ;;  %s821_s21 = smov 64  }
   0x7   :  { %s29_s20 = sshll.u32 %s820_s19, 4  ;;  %s822_s22 = smov 4   ;;  %s30_s20 = int_to_ptr.vmem [resolvable:$true] %s29_s20 }
   0x8   :  { %35 = dma.hbm_to_vmem [thread:$0]  %s28_s16, 2048, %s30_s20, [#allocation7], %s821_s21, %s821_s21, %s822_s22  }
   0x9   :  { %811 = dma.done.wait [#allocation4], 2048  }
   0xa   :  { %812 = vsyncadd [#allocation4], 4294965248 }
   0xb   :  { %813 = dma.done.wait [#allocation7], 2048  }
   0xc   :  { %814 = vsyncadd [#allocation7], 4294965248  ;;  %v660_v0 = vld [vmem:[#allocation6 + $0x38] sm:$0xff]  ;;  %v659_v2 = vld [vmem:[#allocation6 + $0x30] sm:$0xff]  ;;  %s823_s0 = smov [#allocation8]   ;;  %s495_s25 = sshll.u32 %s856_s2, 4  ;;  %s496_s25 = int_to_ptr.hbm [resolvable:$true] %s495_s25 }
   0xd   :  { %v668_v1 = vld [vmem:[#allocation6 + $0x78] sm:$0xff]  ;;  %268 = vmatpush.bf16.msra.mxu0 %v660_v0  ;;  %716 = vmatpush.bf16.msra.mxu2 %v660_v0  ;;  %v667_v3 = vld [vmem:[#allocation6 + $0x70] sm:$0xff]  ;;  %v658_v4 = vld [vmem:[#allocation6 + $0x28] sm:$0xff]  ;;  %s493_s1 = sshll.u32 %s823_s0, 4  ;;  %s494_s1 = int_to_ptr.vmem [resolvable:$true] %s493_s1 }
   0xe   :  { %317 = vmatpush.bf16.msra.mxu1 %v668_v1  ;;  %724 = vmatpush.bf16.msra.mxu3 %v668_v1  ;;  %v666_v5 = vld [vmem:[#allocation6 + $0x68] sm:$0xff]  ;;  %v657_v6 = vld [vmem:[#allocation6 + $0x20] sm:$0xff]  ;;  %v656_v8 = vld [vmem:[#allocation6 + $0x18] sm:$0xff] }
   0xf   :  { %v665_v7 = vld [vmem:[#allocation6 + $0x60] sm:$0xff]  ;;  %v664_v9 = vld [vmem:[#allocation6 + $0x58] sm:$0xff]  ;;  %v655_v10 = vld [vmem:[#allocation6 + $0x10] sm:$0xff] }
  0x10   :  { %v663_v11 = vld [vmem:[#allocation6 + $0x50] sm:$0xff]  ;;  %v654_v12 = vld [vmem:[#allocation6 + $0x8] sm:$0xff]  ;;  %v653_v14 = vld [vmem:[#allocation6] sm:$0xff] }
  0x11   :  { %269 = vmatpush.bf16.msra.mxu0 %v659_v2  ;;  %717 = vmatpush.bf16.msra.mxu2 %v659_v2  ;;  %v662_v13 = vld [vmem:[#allocation6 + $0x48] sm:$0xff]  ;;  %v661_v15 = vld [vmem:[#allocation6 + $0x40] sm:$0xff]  ;;  %v519_v28 = vld [vmem:[#allocation3 + $0x10] sm:$0xf] }
  0x12   :  { %318 = vmatpush.bf16.msra.mxu1 %v667_v3  ;;  %725 = vmatpush.bf16.msra.mxu3 %v667_v3  ;;  %v511_v16 = vld [vmem:[#allocation3] sm:$0xf]  ;;  %v638_v17 = vld [vmem:[#allocation3 + $0x4] sm:$0xf0]  ;;  %v637_v20 = vld [vmem:[#allocation3 + $0x4] sm:$0xf] }
  0x13   :  { %v543_v18 = vld [vmem:[#allocation3 + $0x40] sm:$0xf]  ;;  %v646_v19 = vld [vmem:[#allocation3 + $0x44] sm:$0xf0]  ;;  %v513_v21 = vld [vmem:[#allocation3 + $0x8] sm:$0xf0]  ;;  %v512_v24 = vor.u32 %v638_v17, %v511_v16 }
  0x14   :  { %v645_v22 = vld [vmem:[#allocation3 + $0x44] sm:$0xf]  ;;  %v545_v23 = vld [vmem:[#allocation3 + $0x48] sm:$0xf0]  ;;  %v544_v25 = vor.u32 %v646_v19, %v543_v18  ;;  %v516_v26 = vor.u32 %v637_v20, %v513_v21  ;;  %v640_v29 = vld [vmem:[#allocation3 + $0x14] sm:$0xf0] }
  0x15   :  { %270 = vmatpush.bf16.msra.mxu0 %v658_v4  ;;  %718 = vmatpush.bf16.msra.mxu2 %v658_v4  ;;  %v548_v27 = vor.u32 %v645_v22, %v545_v23  ;;  %v551_v30 = vld [vmem:[#allocation3 + $0x50] sm:$0xf]  ;;  %v648_v31 = vld [vmem:[#allocation3 + $0x54] sm:$0xf0]  ;;  %v639_v32 = vld [vmem:[#allocation3 + $0x14] sm:$0xf]  ;;  %v520_v36 = vor.u32 %v640_v29, %v519_v28 }
  0x16   :  { %319 = vmatpush.bf16.msra.mxu1 %v666_v5  ;;  %726 = vmatpush.bf16.msra.mxu3 %v666_v5  ;;  %v521_v33 = vld [vmem:[#allocation3 + $0x18] sm:$0xf0]  ;;  %v647_v34 = vld [vmem:[#allocation3 + $0x54] sm:$0xf]  ;;  %v552_v37 = vor.u32 %v648_v31, %v551_v30  ;;  %v527_v40 = vld [vmem:[#allocation3 + $0x20] sm:$0xf] }
  0x17   :  { %v553_v35 = vld [vmem:[#allocation3 + $0x58] sm:$0xf0]  ;;  %v524_v38 = vor.u32 %v639_v32, %v521_v33  ;;  %v642_v41 = vld [vmem:[#allocation3 + $0x24] sm:$0xf0]  ;;  %v559_v42 = vld [vmem:[#allocation3 + $0x60] sm:$0xf] }
  0x18   :  { %v556_v39 = vor.u32 %v647_v34, %v553_v35  ;;  %v650_v43 = vld [vmem:[#allocation3 + $0x64] sm:$0xf0]  ;;  %v641_v44 = vld [vmem:[#allocation3 + $0x24] sm:$0xf]  ;;  %v529_v45 = vld [vmem:[#allocation3 + $0x28] sm:$0xf0]  ;;  %v528_v48 = vor.u32 %v642_v41, %v527_v40 }
  0x19   :  { %271 = vmatpush.bf16.msra.mxu0 %v657_v6  ;;  %719 = vmatpush.bf16.msra.mxu2 %v657_v6  ;;  %v649_v46 = vld [vmem:[#allocation3 + $0x64] sm:$0xf]  ;;  %v561_v47 = vld [vmem:[#allocation3 + $0x68] sm:$0xf0]  ;;  %v560_v49 = vor.u32 %v650_v43, %v559_v42  ;;  %v532_v50 = vor.u32 %v641_v44, %v529_v45  ;;  %v535_v52 = vld [vmem:[#allocation3 + $0x30] sm:$0xf] }
  0x1a   :  { %320 = vmatpush.bf16.msra.mxu1 %v665_v7  ;;  %727 = vmatpush.bf16.msra.mxu3 %v665_v7  ;;  %v564_v51 = vor.u32 %v649_v46, %v561_v47  ;;  %v644_v53 = vld [vmem:[#allocation3 + $0x34] sm:$0xf0]  ;;  %v567_v54 = vld [vmem:[#allocation3 + $0x70] sm:$0xf]  ;;  %v643_v56 = vld [vmem:[#allocation3 + $0x34] sm:$0xf] }
  0x1b   :  { %v652_v55 = vld [vmem:[#allocation3 + $0x74] sm:$0xf0]  ;;  %v537_v57 = vld [vmem:[#allocation3 + $0x38] sm:$0xf0]  ;;  %v651_v58 = vld [vmem:[#allocation3 + $0x74] sm:$0xf]  ;;  %v536_v60 = vor.u32 %v644_v53, %v535_v52 }
  0x1c   :  { %v569_v59 = vld [vmem:[#allocation3 + $0x78] sm:$0xf0]  ;;  %v568_v61 = vor.u32 %v652_v55, %v567_v54  ;;  %v540_v62 = vor.u32 %v643_v56, %v537_v57 }
  0x1d   :  { %272 = vmatpush.bf16.msra.mxu0 %v656_v8  ;;  %720 = vmatpush.bf16.msra.mxu2 %v656_v8  ;;  %v572_v63 = vor.u32 %v651_v58, %v569_v59 }
  0x1e   :  { %321 = vmatpush.bf16.msra.mxu1 %v664_v9  ;;  %728 = vmatpush.bf16.msra.mxu3 %v664_v9 }
  0x21   :  { %273 = vmatpush.bf16.msra.mxu0 %v655_v10  ;;  %721 = vmatpush.bf16.msra.mxu2 %v655_v10 }
  0x22   :  { %322 = vmatpush.bf16.msra.mxu1 %v663_v11  ;;  %729 = vmatpush.bf16.msra.mxu3 %v663_v11 }
  0x25   :  { %274 = vmatpush.bf16.msra.mxu0 %v654_v12  ;;  %722 = vmatpush.bf16.msra.mxu2 %v654_v12 }
  0x26   :  { %323 = vmatpush.bf16.msra.mxu1 %v662_v13  ;;  %730 = vmatpush.bf16.msra.mxu3 %v662_v13 }
  0x29   :  { %275 = vmatpush.bf16.msra.mxu0 %v653_v14  ;;  %723 = vmatpush.bf16.msra.mxu2 %v653_v14 }
  0x2a   :  { %324 = vmatpush.bf16.msra.mxu1 %v661_v15  ;;  %731 = vmatpush.bf16.msra.mxu3 %v661_v15 }
  0x2c   :  { %276 = vmatmul.bf16.vlgmr.msra.gmra.mxu0 %v512_v24  ;;  %296 = vmatmul.bf16.vlgmr.msra.gmra.mxu2 %v544_v25 }
  0x2d   :  { %325 = vmatmul.bf16.vlgmr.msra.gmra.mxu1 %v516_v26  ;;  %345 = vmatmul.bf16.vlgmr.msra.gmra.mxu3 %v548_v27 }
  0x3c   :  { %281 = vmatmul.bf16.gmra.mxu0 %v520_v36  ;;  %301 = vmatmul.bf16.gmra.mxu2 %v552_v37 }
  0x3d   :  { %330 = vmatmul.bf16.gmra.mxu1 %v524_v38  ;;  %350 = vmatmul.bf16.gmra.mxu3 %v556_v39 }
  0x4c   :  { %286 = vmatmul.bf16.gmra.mxu0 %v528_v48  ;;  %306 = vmatmul.bf16.gmra.mxu2 %v560_v49 }
  0x4d   :  { %335 = vmatmul.bf16.gmra.mxu1 %v532_v50  ;;  %355 = vmatmul.bf16.gmra.mxu3 %v564_v51 }
  0x5c   :  { %291 = vmatmul.bf16.gmra.mxu0 %v536_v60  ;;  %311 = vmatmul.bf16.gmra.mxu2 %v568_v61 }
  0x5d   :  { %340 = vmatmul.bf16.gmra.mxu1 %v540_v62  ;;  %360 = vmatmul.bf16.gmra.mxu3 %v572_v63 }
  0xa9   :  { %v277_v0 = vpop.f32.mrf.mxu0 }
  0xaa   :  { %v326_v1 = vpop.f32.mrf.mxu1 }
  0xab   :  { %v327_v6 = vadd.f32 %v326_v1, %v277_v0 }
  0xaf   :  { %v297_v2 = vpop.f32.mrf.mxu2 }
  0xb0   :  { %v346_v3 = vpop.f32.mrf.mxu3 }
  0xb1   :  { %v279_v4 = vpop.f32.mrf.mxu0  ;;  %v347_v11 = vadd.f32 %v346_v3, %v297_v2 }
  0xb2   :  { %v328_v5 = vpop.f32.mrf.mxu1 }
  0xb3   :  { %v329_v7 = vadd.f32 %v328_v5, %v279_v4 }
  0xb5   :  { %v672_v8 = vpack.c.bf16 %v329_v7, %v327_v6 }
  0xb7   :  { %673 = vst [vmem:[#allocation8] sm:$0xff] %v672_v8   ;;  %v299_v9 = vpop.f32.mrf.mxu2 }
  0xb8   :  { %v348_v10 = vpop.f32.mrf.mxu3 }
  0xb9   :  { %v349_v12 = vadd.f32 %v348_v10, %v299_v9  ;;  %v282_v13 = vpop.f32.mrf.mxu0 }
  0xba   :  { %v331_v14 = vpop.f32.mrf.mxu1 }
  0xbb   :  { %v692_v15 = vpack.c.bf16 %v349_v12, %v347_v11  ;;  %v332_v20 = vadd.f32 %v331_v14, %v282_v13 }
  0xbd   :  { %712 = vst [vmem:[#allocation8 + $0x20] sm:$0xff] %v692_v15  }
  0xbf   :  { %v302_v16 = vpop.f32.mrf.mxu2 }
  0xc0   :  { %v351_v17 = vpop.f32.mrf.mxu3 }
  0xc1   :  { %v284_v18 = vpop.f32.mrf.mxu0  ;;  %v352_v25 = vadd.f32 %v351_v17, %v302_v16 }
  0xc2   :  { %v333_v19 = vpop.f32.mrf.mxu1 }
  0xc3   :  { %v334_v21 = vadd.f32 %v333_v19, %v284_v18 }
  0xc5   :  { %v677_v22 = vpack.c.bf16 %v334_v21, %v332_v20 }
  0xc7   :  { %709 = vst [vmem:[#allocation8 + $0x8] sm:$0xff] %v677_v22   ;;  %v304_v23 = vpop.f32.mrf.mxu2 }
  0xc8   :  { %v353_v24 = vpop.f32.mrf.mxu3 }
  0xc9   :  { %v354_v26 = vadd.f32 %v353_v24, %v304_v23  ;;  %v287_v27 = vpop.f32.mrf.mxu0 }
  0xca   :  { %v336_v28 = vpop.f32.mrf.mxu1 }
  0xcb   :  { %v697_v29 = vpack.c.bf16 %v354_v26, %v352_v25  ;;  %v337_v34 = vadd.f32 %v336_v28, %v287_v27 }
  0xcd   :  { %713 = vst [vmem:[#allocation8 + $0x28] sm:$0xff] %v697_v29  }
  0xcf   :  { %v307_v30 = vpop.f32.mrf.mxu2 }
  0xd0   :  { %v356_v31 = vpop.f32.mrf.mxu3 }
  0xd1   :  { %v289_v32 = vpop.f32.mrf.mxu0  ;;  %v357_v39 = vadd.f32 %v356_v31, %v307_v30 }
  0xd2   :  { %v338_v33 = vpop.f32.mrf.mxu1 }
  0xd3   :  { %v339_v35 = vadd.f32 %v338_v33, %v289_v32 }
  0xd5   :  { %v682_v36 = vpack.c.bf16 %v339_v35, %v337_v34 }
  0xd7   :  { %710 = vst [vmem:[#allocation8 + $0x10] sm:$0xff] %v682_v36   ;;  %v309_v37 = vpop.f32.mrf.mxu2 }
  0xd8   :  { %v358_v38 = vpop.f32.mrf.mxu3 }
  0xd9   :  { %v359_v40 = vadd.f32 %v358_v38, %v309_v37  ;;  %v292_v41 = vpop.f32.mrf.mxu0 }
  0xda   :  { %v341_v42 = vpop.f32.mrf.mxu1 }
  0xdb   :  { %v702_v43 = vpack.c.bf16 %v359_v40, %v357_v39  ;;  %v342_v48 = vadd.f32 %v341_v42, %v292_v41 }
  0xdd   :  { %714 = vst [vmem:[#allocation8 + $0x30] sm:$0xff] %v702_v43  }
  0xdf   :  { %v312_v44 = vpop.f32.mrf.mxu2 }
  0xe0   :  { %v361_v45 = vpop.f32.mrf.mxu3 }
  0xe1   :  { %v294_v46 = vpop.f32.mrf.mxu0  ;;  %v362_v53 = vadd.f32 %v361_v45, %v312_v44 }
  0xe2   :  { %v343_v47 = vpop.f32.mrf.mxu1 }
  0xe3   :  { %v344_v49 = vadd.f32 %v343_v47, %v294_v46 }
  0xe5   :  { %v687_v50 = vpack.c.bf16 %v344_v49, %v342_v48 }
  0xe7   :  { %711 = vst [vmem:[#allocation8 + $0x18] sm:$0xff] %v687_v50   ;;  %v314_v51 = vpop.f32.mrf.mxu2 }
  0xe8   :  { %v363_v52 = vpop.f32.mrf.mxu3 }
  0xe9   :  { %v364_v54 = vadd.f32 %v363_v52, %v314_v51 }
  0xeb   :  { %v707_v55 = vpack.c.bf16 %v364_v54, %v362_v53 }
  0xed   :  { %715 = vst [vmem:[#allocation8 + $0x38] sm:$0xff] %v707_v55  }
  0xee   :  { %501 = dma.vmem_to_hbm [thread:$0]  %s494_s1, 1024, %s496_s25, [#allocation5], %s821_s21, %s821_s21, %s822_s22  }
  0xef   :  { %815 = dma.done.wait [#allocation5], 1024  }
  0xf0   :  { %816 = vsyncadd [#allocation5], 4294966272 }
  0xf1   :  { %506 = vsyncpa [#allocation4], 1 }
  0xf2   :  { %507 = vsyncpa [#allocation7], 1 }
  0xf3   :  { %508 = vsyncpa [#allocation5], 1 }

</bundles_post_ra>
